<compile_context>
chip_gen: v7x
topology: tpu7x:2x2x1
jax: 0.10.0
libtpu: 0.0.40
codegen_flags: <defaults>
</compile_context>

<pallas_src>
import functools
import math

import jax
import jax.numpy as jnp
from jax.experimental import pallas as pl
from jax.experimental.pallas import tpu as pltpu


def hetero_gnn_pool_kernel(
    x_ref,        # (N, C)    bf16  node features
    a_cat_ref,    # (N, 2N)   bf16  [A_phys | A_reg]  (dst-major, concat over src)
    pool_ref,     # (B, N)    bf16  mean-pool matrix
    w0_ref,       # (C, 2H)   bf16  [W0_phys | W0_reg]
    b0_ref,       # (1, H)    f32   b0_phys + b0_reg (folded)
    w1_ref,       # (H, 2H)   bf16  [W1_phys | W1_reg]
    b1_ref,       # (1, H)    f32
    wh1_ref,      # (H, H)    bf16  prediction-head Linear 1
    bh1_ref,      # (1, H)    f32
    wh2_ref,      # (H, O)    bf16  prediction-head Linear 2
    bh2_ref,      # (1, O)    f32
    out_ref,      # (B, O)    f32
    xpool_ref,    # (B, H)    f32
    stack_ref,    # (2N, H)   bf16  VMEM scratch holding [X@Wp ; X@Wr]
):
    f32 = jnp.float32
    bf16 = jnp.bfloat16
    n = x_ref.shape[0]
    hid = b0_ref.shape[1]

    a_cat = a_cat_ref[...]

    def hetero_layer(h_bf16, w_ref, b_ref):
        # One matmul over both edge types: X @ [Wp | Wr] -> (N, 2H) (f32 acc),
        # restack halves into (2N, H), then a single K=2N aggregation on the MXU:
        #   [A_p | A_r] @ [XWp ; XWr] = A_p @ XWp + A_r @ XWr
        xw = jnp.dot(h_bf16, w_ref[...], preferred_element_type=f32)
        stack_ref[0:n, :] = xw[:, :hid].astype(bf16)
        stack_ref[n:2 * n, :] = xw[:, hid:].astype(bf16)
        m = jnp.dot(a_cat, stack_ref[...], preferred_element_type=f32) + b_ref[...]
        return jnp.maximum(m, 0.0).astype(bf16)   # ReLU in f32, carry bf16

    # ---- HeteroConv layer 0 / layer 1 (GCNConv normalize=False, aggr='sum', ReLU)
    h = hetero_layer(x_ref[...], w0_ref, b0_ref)
    h = hetero_layer(h, w1_ref, b1_ref)

    # ---- global mean pool ----
    xp = jnp.dot(pool_ref[...], h, preferred_element_type=f32)   # (B, H) f32
    xpool_ref[...] = xp

    # ---- prediction head: Linear -> ReLU -> Linear (residual inactive) ----
    hh = jnp.maximum(
        jnp.dot(xp.astype(bf16), wh1_ref[...], preferred_element_type=f32)
        + bh1_ref[...], 0.0)
    out_ref[...] = (jnp.dot(hh.astype(bf16), wh2_ref[...],
                            preferred_element_type=f32) + bh2_ref[...])


def _dense_adj(ei, n):
    # One-hot matmul instead of scatter-add (serial/sort-based on TPU).
    # Duplicate edges accumulate weight > 1, identical to .at[dst, src].add(1.0).
    iota = jnp.arange(n, dtype=ei.dtype)
    src_oh = (ei[0][:, None] == iota[None, :]).astype(jnp.float32)   # (E, N)
    dst_oh = (ei[1][:, None] == iota[None, :]).astype(jnp.float32)   # (E, N)
    return jnp.dot(dst_oh.T, src_oh)                                  # (N_dst, N_src)


def hetero_gnn_pool(x, edge_index_phys, edge_index_reg, batch, num_graphs, params):
    """Glue: adjacency/pool matrices + weight fusion in plain JAX, hot path in Pallas."""
    n, in_ch = x.shape
    hidden = params["w1p"].shape[1]
    out_ch = params["wh2"].shape[1]
    bf16 = jnp.bfloat16

    a_p = _dense_adj(edge_index_phys, n)
    a_r = _dense_adj(edge_index_reg, n)
    a_cat = jnp.concatenate([a_p, a_r], axis=1).astype(bf16)          # (N, 2N)

    onehot = (batch[None, :] == jnp.arange(num_graphs)[:, None]).astype(jnp.float32)
    counts = jnp.maximum(onehot.sum(axis=1, keepdims=True), 1.0)
    pool = (onehot / counts).astype(bf16)                             # 'mean' pooling

    # Fuse per-edge-type weights and fold the paired biases once, outside the kernel.
    w0 = jnp.concatenate([params["w0p"], params["w0r"]], axis=1).astype(bf16)
    w1 = jnp.concatenate([params["w1p"], params["w1r"]], axis=1).astype(bf16)
    b0 = params["b0p"] + params["b0r"]
    b1 = params["b1p"] + params["b1r"]

    args = (
        x.astype(bf16), a_cat, pool,
        w0, b0, w1, b1,
        params["wh1"].astype(bf16), params["bh1"],
        params["wh2"].astype(bf16), params["bh2"],
    )
    vmem = pl.BlockSpec(memory_space=pltpu.MemorySpace.VMEM)
    out_shapes = (
        jax.ShapeDtypeStruct((num_graphs, out_ch), jnp.float32),
        jax.ShapeDtypeStruct((num_graphs, hidden), jnp.float32),
    )

    flops = (2 * n * in_ch * 2 * hidden + 2 * n * (2 * n) * hidden      # layer 0
             + 2 * n * hidden * 2 * hidden + 2 * n * (2 * n) * hidden   # layer 1
             + 2 * num_graphs * n * hidden                              # mean pool
             + 2 * num_graphs * hidden * hidden                         # head Linear 1
             + 2 * num_graphs * hidden * out_ch)                        # head Linear 2
    bytes_accessed = (
        sum(int(a.size) * a.dtype.itemsize for a in args)
        + sum(math.prod(s.shape) * jnp.dtype(s.dtype).itemsize for s in out_shapes))

    return pl.pallas_call(
        hetero_gnn_pool_kernel,
        out_shape=out_shapes,
        in_specs=[vmem] * len(args),
        out_specs=(vmem, vmem),
        scratch_shapes=[pltpu.VMEM((2 * n, hidden), bf16)],
        cost_estimate=pl.CostEstimate(
            flops=flops, transcendentals=0, bytes_accessed=bytes_accessed),
    )(*args)


def reference_forward_f32(x, ei_p, ei_r, batch, num_graphs, params):
    """Exact module semantics, all-f32 (coarse semantic check)."""
    n = x.shape[0]
    a_p = _dense_adj(ei_p, n)
    a_r = _dense_adj(ei_r, n)
    onehot = (batch[None, :] == jnp.arange(num_graphs)[:, None]).astype(jnp.float32)
    pool = onehot / jnp.maximum(onehot.sum(axis=1, keepdims=True), 1.0)
    h = x
    h = jax.nn.relu(a_p @ (h @ params["w0p"]) + params["b0p"]
                    + a_r @ (h @ params["w0r"]) + params["b0r"])
    h = jax.nn.relu(a_p @ (h @ params["w1p"]) + params["b1p"]
                    + a_r @ (h @ params["w1r"]) + params["b1r"])
    xp = pool @ h
    hh = jax.nn.relu(xp @ params["wh1"] + params["bh1"])
    out = hh @ params["wh2"] + params["bh2"]
    return out, xp


def reference_forward_bf16(x, ei_p, ei_r, batch, num_graphs, params):
    """Mirrors the kernel's precision policy: bf16 matmul operands, f32 accumulation."""
    bf = lambda t: t.astype(jnp.bfloat16)
    f32 = jnp.float32
    dot = lambda a, b: jnp.dot(a, b, preferred_element_type=f32)
    n = x.shape[0]
    a_p, a_r = bf(_dense_adj(ei_p, n)), bf(_dense_adj(ei_r, n))
    onehot = (batch[None, :] == jnp.arange(num_graphs)[:, None]).astype(jnp.float32)
    pool = bf(onehot / jnp.maximum(onehot.sum(axis=1, keepdims=True), 1.0))

    h = bf(x)
    for wp, wr, b in (
        (params["w0p"], params["w0r"], params["b0p"] + params["b0r"]),
        (params["w1p"], params["w1r"], params["b1p"] + params["b1r"]),
    ):
        xwp = bf(dot(h, bf(wp)))
        xwr = bf(dot(h, bf(wr)))
        h = bf(jax.nn.relu(dot(a_p, xwp) + dot(a_r, xwr) + b))
    xp = dot(pool, h)
    hh = jax.nn.relu(dot(bf(xp), bf(params["wh1"])) + params["bh1"])
    out = dot(bf(hh), bf(params["wh2"])) + params["bh2"]
    return out, xp


if __name__ == "__main__":
    # Small shapes consistent with the module's forward:
    #   N nodes total over B graphs, in_channels=16, hidden_channels=32,
    #   out_channels=4, num_layers=2, head_num_layers=2, head_hidden=32.
    N, B = 64, 2
    IN_CH, HID, OUT = 16, 32, 4
    E = 128  # edges per edge type

    key = jax.random.PRNGKey(0)
    keys = jax.random.split(key, 16)

    x = jax.random.normal(keys[0], (N, IN_CH), jnp.float32)
    ei_phys = jax.random.randint(keys[1], (2, E), 0, N, jnp.int32)
    ei_reg = jax.random.randint(keys[2], (2, E), 0, N, jnp.int32)
    batch = jnp.repeat(jnp.arange(B, dtype=jnp.int32), N // B)

    def init_w(k, shape, scale=0.1):
        return scale * jax.random.normal(k, shape, jnp.float32)

    # GCNConv lin weights stored as (in, out); biases kept 2-D (1, H) for TPU layout.
    params = {
        "w0p": init_w(keys[3], (IN_CH, HID)), "b0p": init_w(keys[4], (1, HID)),
        "w0r": init_w(keys[5], (IN_CH, HID)), "b0r": init_w(keys[6], (1, HID)),
        "w1p": init_w(keys[7], (HID, HID)),   "b1p": init_w(keys[8], (1, HID)),
        "w1r": init_w(keys[9], (HID, HID)),   "b1r": init_w(keys[10], (1, HID)),
        "wh1": init_w(keys[11], (HID, HID)),  "bh1": init_w(keys[12], (1, HID)),
        "wh2": init_w(keys[13], (HID, OUT)),  "bh2": init_w(keys[14], (1, OUT)),
    }

    # TODO(synk): GCN layer_config has add_self_loops=True, but PyG's GCNConv only
    # adds self-loops inside gcn_norm when normalize=True; with normalize=False
    # (the default here) the raw edge_index is used, which is what we reproduce.

    fwd = jax.jit(functools.partial(hetero_gnn_pool, num_graphs=B, params=params))
    out, x_pool = fwd(x, ei_phys, ei_reg, batch)
    jax.block_until_ready((out, x_pool))

    # Tight check against a reference that mirrors the kernel's bf16-operand /
    # f32-accumulation precision policy.
    ref_out_mp, ref_pool_mp = reference_forward_bf16(x, ei_phys, ei_reg, batch, B, params)
    assert jnp.allclose(out, ref_out_mp, atol=2e-3, rtol=2e-3)
    assert jnp.allclose(x_pool, ref_pool_mp, atol=2e-3, rtol=2e-3)

    # Coarse semantic check against the exact all-f32 forward (only difference is
    # bf16 rounding of the matmul operands).
    ref_out, ref_pool = reference_forward_f32(x, ei_phys, ei_reg, batch, B, params)
    assert jnp.allclose(out, ref_out, atol=1e-1, rtol=1e-1)
    assert jnp.allclose(x_pool, ref_pool, atol=1e-1, rtol=1e-1)

    assert out.shape == (B, OUT) and x_pool.shape == (B, HID)
    print("KERNEL_OK")
</pallas_src>

<mosaic_0001>
module attributes {stable_mosaic.version = 11 : i64} {
  func.func @hetero_gnn_pool_kernel(%arg0: memref<64x16xbf16, #tpu.memory_space<vmem>>, %arg1: memref<64x128xbf16, #tpu.memory_space<vmem>>, %arg2: memref<2x64xbf16, #tpu.memory_space<vmem>>, %arg3: memref<16x64xbf16, #tpu.memory_space<vmem>>, %arg4: memref<1x32xf32, #tpu.memory_space<vmem>>, %arg5: memref<32x64xbf16, #tpu.memory_space<vmem>>, %arg6: memref<1x32xf32, #tpu.memory_space<vmem>>, %arg7: memref<32x32xbf16, #tpu.memory_space<vmem>>, %arg8: memref<1x32xf32, #tpu.memory_space<vmem>>, %arg9: memref<32x4xbf16, #tpu.memory_space<vmem>>, %arg10: memref<1x4xf32, #tpu.memory_space<vmem>>, %arg11: memref<2x4xf32, #tpu.memory_space<vmem>>, %arg12: memref<2x32xf32, #tpu.memory_space<vmem>>, %arg13: memref<128x32xbf16, #tpu.memory_space<vmem>>) attributes {dimension_semantics = [], scalar_prefetch = 0 : i64, scratch_operands = 1 : i64, tpu.core_type = #tpu.core_type<tc>} {
    %c0 = arith.constant 0 : index
    %c0_0 = arith.constant 0 : index
    %0 = vector.load %arg1[%c0, %c0_0] : memref<64x128xbf16, #tpu.memory_space<vmem>>, vector<64x128xbf16>
    %c0_1 = arith.constant 0 : index
    %c0_2 = arith.constant 0 : index
    %1 = vector.load %arg0[%c0_1, %c0_2] : memref<64x16xbf16, #tpu.memory_space<vmem>>, vector<64x16xbf16>
    %c0_3 = arith.constant 0 : index
    %c0_4 = arith.constant 0 : index
    %2 = vector.load %arg3[%c0_3, %c0_4] : memref<16x64xbf16, #tpu.memory_space<vmem>>, vector<16x64xbf16>
    %cst = arith.constant dense<0.000000e+00> : vector<64x64xf32>
    %3 = tpu.matmul %1, %2, %cst {dimension_numbers = #tpu.dot_dimension_numbers<[1], [0], [0], [1], [0, 0, 1, 1], [], []>} : vector<64x16xbf16>, vector<16x64xbf16>, vector<64x64xf32> -> vector<64x64xf32>
    %4 = vector.extract_strided_slice %3 {offsets = [0, 0], sizes = [64, 32], strides = [1, 1]} : vector<64x64xf32> to vector<64x32xf32>
    %5 = arith.truncf %4 : vector<64x32xf32> to vector<64x32xbf16>
    %c0_5 = arith.constant 0 : index
    %c0_6 = arith.constant 0 : index
    %6 = vector.load %arg13[%c0_5, %c0_6] : memref<128x32xbf16, #tpu.memory_space<vmem>>, vector<64x32xbf16>
    tpu.vector_store %arg13[%c0_5, %c0_6], %5 {strides = array<i32>} : memref<128x32xbf16, #tpu.memory_space<vmem>>, vector<64x32xbf16>,
    %7 = vector.extract_strided_slice %3 {offsets = [0, 32], sizes = [64, 32], strides = [1, 1]} : vector<64x64xf32> to vector<64x32xf32>
    %8 = arith.truncf %7 : vector<64x32xf32> to vector<64x32xbf16>
    %c64 = arith.constant 64 : index
    %c0_7 = arith.constant 0 : index
    %9 = vector.load %arg13[%c64, %c0_7] : memref<128x32xbf16, #tpu.memory_space<vmem>>, vector<64x32xbf16>
    tpu.vector_store %arg13[%c64, %c0_7], %8 {strides = array<i32>} : memref<128x32xbf16, #tpu.memory_space<vmem>>, vector<64x32xbf16>,
    %c0_8 = arith.constant 0 : index
    %c0_9 = arith.constant 0 : index
    %10 = vector.load %arg13[%c0_8, %c0_9] : memref<128x32xbf16, #tpu.memory_space<vmem>>, vector<128x32xbf16>
    %cst_10 = arith.constant dense<0.000000e+00> : vector<64x32xf32>
    %11 = tpu.matmul %0, %10, %cst_10 {dimension_numbers = #tpu.dot_dimension_numbers<[1], [0], [0], [1], [0, 0, 1, 1], [], []>} : vector<64x128xbf16>, vector<128x32xbf16>, vector<64x32xf32> -> vector<64x32xf32>
    %c0_11 = arith.constant 0 : index
    %c0_12 = arith.constant 0 : index
    %12 = vector.load %arg4[%c0_11, %c0_12] : memref<1x32xf32, #tpu.memory_space<vmem>>, vector<1x32xf32>
    %13 = vector.broadcast %12 : vector<1x32xf32> to vector<64x32xf32>
    %14 = arith.addf %11, %13 : vector<64x32xf32>
    %cst_13 = arith.constant 0.000000e+00 : f32
    %15 = vector.broadcast %cst_13 : f32 to vector<64x32xf32>
    %16 = arith.maximumf %14, %15 : vector<64x32xf32>
    %17 = arith.truncf %16 : vector<64x32xf32> to vector<64x32xbf16>
    %c0_14 = arith.constant 0 : index
    %c0_15 = arith.constant 0 : index
    %18 = vector.load %arg5[%c0_14, %c0_15] : memref<32x64xbf16, #tpu.memory_space<vmem>>, vector<32x64xbf16>
    %cst_16 = arith.constant dense<0.000000e+00> : vector<64x64xf32>
    %19 = tpu.matmul %17, %18, %cst_16 {dimension_numbers = #tpu.dot_dimension_numbers<[1], [0], [0], [1], [0, 0, 1, 1], [], []>} : vector<64x32xbf16>, vector<32x64xbf16>, vector<64x64xf32> -> vector<64x64xf32>
    %20 = vector.extract_strided_slice %19 {offsets = [0, 0], sizes = [64, 32], strides = [1, 1]} : vector<64x64xf32> to vector<64x32xf32>
    %21 = arith.truncf %20 : vector<64x32xf32> to vector<64x32xbf16>
    %c0_17 = arith.constant 0 : index
    %c0_18 = arith.constant 0 : index
    %22 = vector.load %arg13[%c0_17, %c0_18] : memref<128x32xbf16, #tpu.memory_space<vmem>>, vector<64x32xbf16>
    tpu.vector_store %arg13[%c0_17, %c0_18], %21 {strides = array<i32>} : memref<128x32xbf16, #tpu.memory_space<vmem>>, vector<64x32xbf16>,
    %23 = vector.extract_strided_slice %19 {offsets = [0, 32], sizes = [64, 32], strides = [1, 1]} : vector<64x64xf32> to vector<64x32xf32>
    %24 = arith.truncf %23 : vector<64x32xf32> to vector<64x32xbf16>
    %c64_19 = arith.constant 64 : index
    %c0_20 = arith.constant 0 : index
    %25 = vector.load %arg13[%c64_19, %c0_20] : memref<128x32xbf16, #tpu.memory_space<vmem>>, vector<64x32xbf16>
    tpu.vector_store %arg13[%c64_19, %c0_20], %24 {strides = array<i32>} : memref<128x32xbf16, #tpu.memory_space<vmem>>, vector<64x32xbf16>,
    %c0_21 = arith.constant 0 : index
    %c0_22 = arith.constant 0 : index
    %26 = vector.load %arg13[%c0_21, %c0_22] : memref<128x32xbf16, #tpu.memory_space<vmem>>, vector<128x32xbf16>
    %cst_23 = arith.constant dense<0.000000e+00> : vector<64x32xf32>
    %27 = tpu.matmul %0, %26, %cst_23 {dimension_numbers = #tpu.dot_dimension_numbers<[1], [0], [0], [1], [0, 0, 1, 1], [], []>} : vector<64x128xbf16>, vector<128x32xbf16>, vector<64x32xf32> -> vector<64x32xf32>
    %c0_24 = arith.constant 0 : index
    %c0_25 = arith.constant 0 : index
    %28 = vector.load %arg6[%c0_24, %c0_25] : memref<1x32xf32, #tpu.memory_space<vmem>>, vector<1x32xf32>
    %29 = vector.broadcast %28 : vector<1x32xf32> to vector<64x32xf32>
    %30 = arith.addf %27, %29 : vector<64x32xf32>
    %cst_26 = arith.constant 0.000000e+00 : f32
    %31 = vector.broadcast %cst_26 : f32 to vector<64x32xf32>
    %32 = arith.maximumf %30, %31 : vector<64x32xf32>
    %33 = arith.truncf %32 : vector<64x32xf32> to vector<64x32xbf16>
    %c0_27 = arith.constant 0 : index
    %c0_28 = arith.constant 0 : index
    %34 = vector.load %arg2[%c0_27, %c0_28] : memref<2x64xbf16, #tpu.memory_space<vmem>>, vector<2x64xbf16>
    %cst_29 = arith.constant dense<0.000000e+00> : vector<2x32xf32>
    %35 = tpu.matmul %34, %33, %cst_29 {dimension_numbers = #tpu.dot_dimension_numbers<[1], [0], [0], [1], [0, 0, 1, 1], [], []>} : vector<2x64xbf16>, vector<64x32xbf16>, vector<2x32xf32> -> vector<2x32xf32>
    %c0_30 = arith.constant 0 : index
    %c0_31 = arith.constant 0 : index
    %36 = vector.load %arg12[%c0_30, %c0_31] : memref<2x32xf32, #tpu.memory_space<vmem>>, vector<2x32xf32>
    tpu.vector_store %arg12[%c0_30, %c0_31], %35 {strides = array<i32>} : memref<2x32xf32, #tpu.memory_space<vmem>>, vector<2x32xf32>,
    %37 = arith.truncf %35 : vector<2x32xf32> to vector<2x32xbf16>
    %c0_32 = arith.constant 0 : index
    %c0_33 = arith.constant 0 : index
    %38 = vector.load %arg7[%c0_32, %c0_33] : memref<32x32xbf16, #tpu.memory_space<vmem>>, vector<32x32xbf16>
    %cst_34 = arith.constant dense<0.000000e+00> : vector<2x32xf32>
    %39 = tpu.matmul %37, %38, %cst_34 {dimension_numbers = #tpu.dot_dimension_numbers<[1], [0], [0], [1], [0, 0, 1, 1], [], []>} : vector<2x32xbf16>, vector<32x32xbf16>, vector<2x32xf32> -> vector<2x32xf32>
    %c0_35 = arith.constant 0 : index
    %c0_36 = arith.constant 0 : index
    %40 = vector.load %arg8[%c0_35, %c0_36] : memref<1x32xf32, #tpu.memory_space<vmem>>, vector<1x32xf32>
    %41 = vector.broadcast %40 : vector<1x32xf32> to vector<2x32xf32>
    %42 = arith.addf %39, %41 : vector<2x32xf32>
    %cst_37 = arith.constant 0.000000e+00 : f32
    %43 = vector.broadcast %cst_37 : f32 to vector<2x32xf32>
    %44 = arith.maximumf %42, %43 : vector<2x32xf32>
    %45 = arith.truncf %44 : vector<2x32xf32> to vector<2x32xbf16>
    %c0_38 = arith.constant 0 : index
    %c0_39 = arith.constant 0 : index
    %46 = vector.load %arg9[%c0_38, %c0_39] : memref<32x4xbf16, #tpu.memory_space<vmem>>, vector<32x4xbf16>
    %cst_40 = arith.constant dense<0.000000e+00> : vector<2x4xf32>
    %47 = tpu.matmul %45, %46, %cst_40 {dimension_numbers = #tpu.dot_dimension_numbers<[1], [0], [0], [1], [0, 0, 1, 1], [], []>} : vector<2x32xbf16>, vector<32x4xbf16>, vector<2x4xf32> -> vector<2x4xf32>
    %c0_41 = arith.constant 0 : index
    %c0_42 = arith.constant 0 : index
    %48 = vector.load %arg10[%c0_41, %c0_42] : memref<1x4xf32, #tpu.memory_space<vmem>>, vector<1x4xf32>
    %49 = vector.broadcast %48 : vector<1x4xf32> to vector<2x4xf32>
    %50 = arith.addf %47, %49 : vector<2x4xf32>
    %c0_43 = arith.constant 0 : index
    %c0_44 = arith.constant 0 : index
    %51 = vector.load %arg11[%c0_43, %c0_44] : memref<2x4xf32, #tpu.memory_space<vmem>>, vector<2x4xf32>
    tpu.vector_store %arg11[%c0_43, %c0_44], %50 {strides = array<i32>} : memref<2x4xf32, #tpu.memory_space<vmem>>, vector<2x4xf32>,
    return
  }
}

</mosaic_0001>

<bundles_post_ra>
// kernel: hetero_gnn_pool.1
= control target key start
LH: loop header
LB: loop body
LE: loop exit
PB: predicated region body
PF: predicated region fallthrough
CT: control target
= control target key end

     0   :  { %18 = vsyncpa [#allocation4], 0  ;;  %vm87_vm0 = vcmask 130048   ;;  %s1180_s0 = inlined_call_operand.vmem [shape: bf16[64,16], index: 0, kind: input, shape index: {}]   ;;  %s1181_s1 = inlined_call_operand.vmem [shape: bf16[64,128], index: 1, kind: input, shape index: {}]   ;;  %s1182_s2 = inlined_call_operand.vmem [shape: bf16[2,64], index: 2, kind: input, shape index: {}]   ;;  %s1183_s3 = inlined_call_operand.vmem [shape: bf16[16,64], index: 3, kind: input, shape index: {}]   ;;  %s1184_s4 = inlined_call_operand.vmem [shape: f32[1,32], index: 4, kind: input, shape index: {}]   ;;  %s1185_s5 = inlined_call_operand.vmem [shape: bf16[32,64], index: 5, kind: input, shape index: {}]   ;;  %s1186_s6 = inlined_call_operand.vmem [shape: f32[1,32], index: 6, kind: input, shape index: {}]   ;;  %s1187_s7 = inlined_call_operand.vmem [shape: bf16[32,32], index: 7, kind: input, shape index: {}]   ;;  %s1188_s8 = inlined_call_operand.vmem [shape: f32[1,32], index: 8, kind: input, shape index: {}]   ;;  %s1189_s9 = inlined_call_operand.vmem [shape: bf16[32,4], index: 9, kind: input, shape index: {}]   ;;  %s1190_s10 = inlined_call_operand.vmem [shape: f32[1,4], index: 10, kind: input, shape index: {}]   ;;  %s1191_s11 = inlined_call_operand.hbm [shape: f32[2,4], index: 11, kind: output, shape index: {0}]   ;;  %s1192_s12 = inlined_call_operand.hbm [shape: f32[2,32], index: 12, kind: output, shape index: {1}]  }
   0x1   :  { %v914_v0 = vld [vmem:[%s1183_s3] sm:$0xff]   ;;  %v916_v2 = vld [vmem:[%s1180_s0 + $0x8] sm:$0xff]   ;;  %v917_v3 = vld [vmem:[%s1180_s0 + $0x10] sm:$0xff]  }
   0x2   :  { %v915_v1 = vld [vmem:[%s1180_s0] sm:$0xff]   ;;  %811 = vmatprep.subr.bf16.mxu0 %v914_v0  ;;  %v918_v4 = vld [vmem:[%s1180_s0 + $0x18] sm:$0xff]  }
   0x3   :  { %812 = vmatpush3.bf16.msra.mxu0 %v914_v0  ;;  %813 = vmatprep.mubr.msk.bf16.mxu0 %vm87_vm0, %v915_v1 }
   0x6   :  { %814 = vmatmul.mubr.msk.bf16.vlgmr.msra.gmra.mrb[0].mxu0 %vm87_vm0, %v916_v2 }
   0x7   :  { %817 = vmatprep.mubr.msk.bf16.mxu0 %vm87_vm0, %v917_v3 }
   0x8   :  { %19 = vsyncpa [#allocation6], 0  ;;  %vm169_vm1 = vcmask 261120   ;;  %s977_s30 = smov 96   ;;  %v1072_v18 = vld [vmem:[%s1181_s1] sm:$0xff]   ;;  %v1086_v31 = vld [vmem:[%s1181_s1 + $0x8] sm:$0xff]  }
   0x9   :  { %837 = vmatprep.mubr.bf16.mxu1 %v1072_v18  ;;  %v923_v22 = vld [vmem:[%s1185_s5] sm:$0xff]   ;;  %v1091_v32 = vld [vmem:[%s1181_s1 + $0x10] sm:$0xff]   ;;  %v1098_v33 = vld [vmem:[%s1181_s1 + $0x18] sm:$0xff]   ;;  %vm979_vm2 = vmmov 0   ;;  %vm524_vm3 = vcmask 523264   ;;  %vm568_vm4 = vcmask 254976  }
   0xa   :  { %845 = vmatprep.subr.bf16.mxu0 %v923_v22  ;;  %v924_v34 = vld [vmem:[%s1185_s5 + $0x8] sm:$0xff]   ;;  %v744_v35 = vld [vmem:[%s1184_s4] ss:$0 sm:$0xff]  ;;  %s980_s14 = smov [#allocation5]  }
   0xb   :  { %846 = vmatpush3.bf16.msra.mxu0 %v923_v22  ;;  %s723_s15 = sshll.u32 %s980_s14, 4  ;;  %s724_s15 = int_to_ptr.vmem [resolvable:$true] %s723_s15 }
   0xc   :  { %847 = vmatprep.subr.bf16.mxu0 %v924_v34  ;;  %s929_s16 = scalar_lea.vmem %s724_s15, 32  ;;  %p934_p1 = scmp.lt.s32.totalorder %s724_s15, %s724_s15 }
   0xd   :  { %p930_p0 = scmp.ne.s32.totalorder %s724_s15, %s929_s16  ;;  %p935_p2 = scmp.lt.s32.totalorder %s929_s16, %s929_s16 }
   0xe   :  { %818 = vmatmul.mubr.msk.bf16.gmra.mrb[4].mxu0 %vm87_vm0, %v918_v4 }
   0xf   :  { %848 = vmatpush3.bf16.msra.mxu0 %v924_v34  ;;  %p936_p3 = por %p935_p2, %p934_p1 }
  0x11   :  { %p937_p4 = pnand %p936_p3, %p930_p0 }
  0xd9   :  { %v815_v5 = vpop.f32.mrb[0].mxu0 }
  0xda   :  { %v134_v6 = vpop.f32.mrb[1].mxu0 }
  0xdb   :  { %v816_v7 = vpop.f32.mrb[2].mxu0 }
  0xdc   :  { %v166_v8 = vpack.c.bf16 %v816_v7, %v815_v5  ;;  %v137_v9 = vpop.f32.mrb[3].mxu0 }
  0xdd   :  { %v165_v10 = vpack.c.bf16 %v137_v9, %v134_v6 }
  0xde   :  { %171 = vst.msk [vmem:[#allocation2 + $0x8] sm:$0xff] %vm169_vm1, %v166_v8 }
  0xdf   :  { %170 = vst.msk [vmem:[#allocation2] sm:$0xff] %vm169_vm1, %v165_v10  ;;  %178 = vrot.lane.b32.xlu0 %v165_v10, %s977_s30 }
  0xe1   :  { %v819_v11 = vpop.f32.mrb[4].mxu0 }
  0xe2   :  { %v150_v12 = vpop.f32.mrb[5].mxu0 }
  0xe3   :  { %180 = vrot.lane.b32.xlu0 %v166_v8, %s977_s30  ;;  %v820_v13 = vpop.f32.mrb[6].mxu0 }
  0xe4   :  { %v168_v14 = vpack.c.bf16 %v820_v13, %v819_v11  ;;  %v153_v15 = vpop.f32.mrb[7].mxu0 }
  0xe5   :  { %v167_v16 = vpack.c.bf16 %v153_v15, %v150_v12  ;;  %v195_v19 = vld [vmem:[#allocation2 + $0x8] sm:$0xff] }
  0xe6   :  { %173 = vst.msk [vmem:[#allocation2 + $0x18] sm:$0xff] %vm169_vm1, %v168_v14  ;;  %v194_v17 = vld [vmem:[#allocation2] sm:$0xff] }
  0xe7   :  { %172 = vst.msk [vmem:[#allocation2 + $0x10] sm:$0xff] %vm169_vm1, %v167_v16  ;;  %821 = vmatprep.subr.bf16.mxu1 %v194_v17  ;;  %182 = vrot.lane.b32.xlu1 %v167_v16, %s977_s30 }
  0xe8   :  { %822 = vmatpush3.bf16.msra.mxu1 %v194_v17 }
  0xe9   :  { %823 = vmatprep.subr.bf16.mxu1 %v195_v19 }
  0xeb   :  { %184 = vrot.lane.b32.xlu1 %v168_v14, %s977_s30 }
  0xec   :  { %824 = vmatpush3.bf16.msra.mxu1 %v195_v19 }
  0xed   :  { %v197_v21 = vld [vmem:[#allocation2 + $0x18] sm:$0xff] }
  0xee   :  { %v196_v20 = vld [vmem:[#allocation2 + $0x10] sm:$0xff] }
  0xef   :  { %825 = vmatprep.subr.bf16.mxu1 %v196_v20 }
  0xf0   :  { %826 = vmatpush3.bf16.msra.mxu1 %v196_v20 }
  0xf1   :  { %827 = vmatprep.subr.bf16.mxu1 %v197_v21 }
  0xf4   :  { %828 = vmatpush3.bf16.msra.mxu1 %v197_v21 }
 0x151   :  { %v179_v23 = vpop.permute.xlu0 %178 }
 0x152   :  { %190 = vst.msk [vmem:[#allocation2 + $0x20] sm:$0xff] %vm169_vm1, %v179_v23 }
 0x155   :  { %v181_v24 = vpop.permute.xlu0 %180 }
 0x156   :  { %191 = vst.msk [vmem:[#allocation2 + $0x28] sm:$0xff] %vm169_vm1, %v181_v24  ;;  %v978_v24 = vmov 0.0  }
 0x159   :  { %v183_v25 = vpop.permute.xlu1 %182  ;;  %v198_v26 = vld [vmem:[#allocation2 + $0x20] sm:$0xff] }
 0x15a   :  { %192 = vst.msk [vmem:[#allocation2 + $0x30] sm:$0xff] %vm169_vm1, %v183_v25  ;;  %829 = vmatprep.subr.bf16.mxu1 %v198_v26  ;;  %v755_v25 = vld [vmem:[%s1186_s6] ss:$0 sm:$0xff] }
 0x15b   :  { %830 = vmatpush3.bf16.msra.mxu1 %v198_v26 }
 0x15d   :  { %v185_v27 = vpop.permute.xlu1 %184  ;;  %v199_v28 = vld [vmem:[#allocation2 + $0x28] sm:$0xff] }
 0x15e   :  { %193 = vst.msk [vmem:[#allocation2 + $0x38] sm:$0xff] %vm169_vm1, %v185_v27  ;;  %831 = vmatprep.subr.bf16.mxu1 %v199_v28 }
 0x15f   :  { %832 = vmatpush3.bf16.msra.mxu1 %v199_v28 }
 0x161   :  { %v200_v29 = vld [vmem:[#allocation2 + $0x30] sm:$0xff] }
 0x162   :  { %833 = vmatprep.subr.bf16.mxu1 %v200_v29 }
 0x163   :  { %834 = vmatpush3.bf16.msra.mxu1 %v200_v29 }
 0x165   :  { %v201_v30 = vld [vmem:[#allocation2 + $0x38] sm:$0xff] }
 0x166   :  { %835 = vmatprep.subr.bf16.mxu1 %v201_v30 }
 0x167   :  { %836 = vmatpush3.bf16.msra.mxu1 %v201_v30 }
 0x168   :  { %881 = vmatprep.subr.bf16.mxu1 %v978_v24 }
 0x16a   :  { %838 = vmatmul.mubr.bf16.vlgmr.msra.gmra.mrb[0].mxu1 %v1086_v31 }
 0x16b   :  { %841 = vmatprep.mubr.bf16.mxu1 %v1091_v32 }
 0x172   :  { %842 = vmatmul.mubr.bf16.gmra.mrb[4].mxu1 %v1098_v33 }
 0x173   :  { %889 = vmatprep.mubr.msk.bf16.mxu1 %vm979_vm2, %v978_v24 }
 0x23d   :  { %v839_v36 = vpop.f32.mrb[0].mxu1 }
 0x23e   :  { %v276_v37 = vadd.f32 %v839_v36, %v744_v35  ;;  %v267_v38 = vpop.f32.mrb[1].mxu1 }
 0x23f   :  { %v268_v39 = vadd.f32 %v744_v35, %v267_v38  ;;  %v840_v40 = vpop.f32.mrb[2].mxu1 }
 0x240   :  { %v279_v41 = vadd.f32 %v840_v40, %v744_v35  ;;  %v270_v42 = vpop.f32.mrb[3].mxu1  ;;  %v300_v44 = vmax.f32 %v276_v37, 0.0 }
 0x241   :  { %v271_v43 = vadd.f32 %v744_v35, %v270_v42  ;;  %v298_v46 = vmax.f32 %v268_v39, 0.0 }
 0x242   :  { %v301_v45 = vmax.f32 %v279_v41, 0.0 }
 0x243   :  { %v299_v47 = vmax.f32 %v271_v43, 0.0 }
 0x244   :  { %v307_v48 = vpack.c.bf16 %v301_v45, %v300_v44 }
 0x245   :  { %v306_v49 = vpack.c.bf16 %v299_v47, %v298_v46  ;;  %v843_v50 = vpop.f32.mrb[4].mxu1 }
 0x246   :  { %v292_v51 = vadd.f32 %v843_v50, %v744_v35  ;;  %v283_v52 = vpop.f32.mrb[5].mxu1 }
 0x247   :  { %v284_v53 = vadd.f32 %v744_v35, %v283_v52  ;;  %v844_v54 = vpop.f32.mrb[6].mxu1  ;;  %849 = vmatprep.mubr.msk.bf16.mxu0 %vm169_vm1, %v306_v49 }
 0x248   :  { %v295_v55 = vadd.f32 %v844_v54, %v744_v35  ;;  %v286_v56 = vpop.f32.mrb[7].mxu1  ;;  %850 = vmatmul.mubr.msk.bf16.vlgmr.msra.gmra.mrb[8].mxu0 %vm169_vm1, %v307_v48  ;;  %v304_v58 = vmax.f32 %v292_v51, 0.0  ;;  %v523_v54 = vld [vmem:[%s1182_s2] sm:$0x1] }
 0x249   :  { %v287_v57 = vadd.f32 %v744_v35, %v286_v56  ;;  %v302_v60 = vmax.f32 %v284_v53, 0.0  ;;  %v926_v56 = vld [vmem:[%s1187_s7 + $0x8] sm:$0xff]  }
 0x24a   :  { %v305_v59 = vmax.f32 %v295_v55, 0.0  ;;  %v925_v55 = vld [vmem:[%s1187_s7] sm:$0xff]  }
 0x24b   :  { %v303_v61 = vmax.f32 %v287_v57, 0.0 }
 0x24c   :  { %v309_v62 = vpack.c.bf16 %v305_v59, %v304_v58 }
 0x24d   :  { %v308_v63 = vpack.c.bf16 %v303_v61, %v302_v60 }
 0x24f   :  { %853 = vmatprep.mubr.msk.bf16.mxu0 %vm169_vm1, %v308_v63  ;;  %v928_v63 = vld [vmem:[%s1189_s9 + $0x8] sm:$0xff]  }
 0x250   :  { %854 = vmatmul.mubr.msk.bf16.gmra.mrb[12].mxu0 %vm169_vm1, %v309_v62  ;;  %v927_v62 = vld [vmem:[%s1189_s9] sm:$0xff]  }
 0x251   :  { %873 = vmatprep.mubr.bf16.mxu0 %v1072_v18 }
 0x31b   :  { %v851_v0 = vpop.f32.mrb[8].mxu0 }
 0x31c   :  { %v372_v1 = vpop.f32.mrb[9].mxu0 }
 0x31d   :  { %v852_v2 = vpop.f32.mrb[10].mxu0 }
 0x31e   :  { %v404_v3 = vpack.c.bf16 %v852_v2, %v851_v0  ;;  %v375_v4 = vpop.f32.mrb[11].mxu0  ;;  %v757_v0 = vld [vmem:[%s1188_s8] ss:$0 sm:$0xff] }
 0x31f   :  { %v403_v5 = vpack.c.bf16 %v375_v4, %v372_v1 }
 0x320   :  { %408 = vst.msk [vmem:[#allocation2 + $0x8] sm:$0xff] %vm169_vm1, %v404_v3  ;;  %417 = vrot.lane.b32.xlu1 %v404_v3, %s977_s30 }
 0x321   :  { %407 = vst.msk [vmem:[#allocation2] sm:$0xff] %vm169_vm1, %v403_v5  ;;  %415 = vrot.lane.b32.xlu0 %v403_v5, %s977_s30 }
 0x323   :  { %v855_v6 = vpop.f32.mrb[12].mxu0 }
 0x324   :  { %v388_v7 = vpop.f32.mrb[13].mxu0 }
 0x325   :  { %v856_v8 = vpop.f32.mrb[14].mxu0 }
 0x326   :  { %v406_v9 = vpack.c.bf16 %v856_v8, %v855_v6  ;;  %v391_v10 = vpop.f32.mrb[15].mxu0 }
 0x327   :  { %v405_v11 = vpack.c.bf16 %v391_v10, %v388_v7  ;;  %v432_v13 = vld [vmem:[#allocation2 + $0x8] sm:$0xff] }
 0x328   :  { %410 = vst.msk [vmem:[#allocation2 + $0x18] sm:$0xff] %vm169_vm1, %v406_v9  ;;  %421 = vrot.lane.b32.xlu1 %v406_v9, %s977_s30  ;;  %v431_v12 = vld [vmem:[#allocation2] sm:$0xff] }
 0x329   :  { %409 = vst.msk [vmem:[#allocation2 + $0x10] sm:$0xff] %vm169_vm1, %v405_v11  ;;  %857 = vmatprep.subr.bf16.mxu0 %v431_v12  ;;  %419 = vrot.lane.b32.xlu0 %v405_v11, %s977_s30 }
 0x32a   :  { %858 = vmatpush3.bf16.msra.mxu0 %v431_v12 }
 0x32b   :  { %859 = vmatprep.subr.bf16.mxu0 %v432_v13 }
 0x32e   :  { %860 = vmatpush3.bf16.msra.mxu0 %v432_v13 }
 0x32f   :  { %v434_v15 = vld [vmem:[#allocation2 + $0x18] sm:$0xff] }
 0x330   :  { %v433_v14 = vld [vmem:[#allocation2 + $0x10] sm:$0xff] }
 0x331   :  { %861 = vmatprep.subr.bf16.mxu0 %v433_v14 }
 0x332   :  { %862 = vmatpush3.bf16.msra.mxu0 %v433_v14 }
 0x333   :  { %863 = vmatprep.subr.bf16.mxu0 %v434_v15 }
 0x336   :  { %864 = vmatpush3.bf16.msra.mxu0 %v434_v15 }
 0x392   :  { %v418_v16 = vpop.permute.xlu1 %417 }
 0x393   :  { %428 = vst.msk [vmem:[#allocation2 + $0x28] sm:$0xff] %vm169_vm1, %v418_v16  ;;  %v416_v17 = vpop.permute.xlu0 %415 }
 0x394   :  { %427 = vst.msk [vmem:[#allocation2 + $0x20] sm:$0xff] %vm169_vm1, %v416_v17 }
 0x39a   :  { %v422_v18 = vpop.permute.xlu1 %421  ;;  %v436_v21 = vld [vmem:[#allocation2 + $0x28] sm:$0xff] }
 0x39b   :  { %430 = vst.msk [vmem:[#allocation2 + $0x38] sm:$0xff] %vm169_vm1, %v422_v18  ;;  %v420_v19 = vpop.permute.xlu0 %419  ;;  %v435_v20 = vld [vmem:[#allocation2 + $0x20] sm:$0xff] }
 0x39c   :  { %429 = vst.msk [vmem:[#allocation2 + $0x30] sm:$0xff] %vm169_vm1, %v420_v19  ;;  %865 = vmatprep.subr.bf16.mxu0 %v435_v20 }
 0x39d   :  { %866 = vmatpush3.bf16.msra.mxu0 %v435_v20 }
 0x39e   :  { %867 = vmatprep.subr.bf16.mxu0 %v436_v21 }
 0x3a1   :  { %868 = vmatpush3.bf16.msra.mxu0 %v436_v21 }
 0x3a2   :  { %v438_v23 = vld [vmem:[#allocation2 + $0x38] sm:$0xff] }
 0x3a3   :  { %v437_v22 = vld [vmem:[#allocation2 + $0x30] sm:$0xff] }
 0x3a4   :  { %869 = vmatprep.subr.bf16.mxu0 %v437_v22 }
 0x3a5   :  { %870 = vmatpush3.bf16.msra.mxu0 %v437_v22 }
 0x3a6   :  { %871 = vmatprep.subr.bf16.mxu0 %v438_v23 }
 0x3a9   :  { %872 = vmatpush3.bf16.msra.mxu0 %v438_v23 }
 0x3ac   :  { %874 = vmatmul.mubr.bf16.vlgmr.msra.gmra.mrb[16].mxu0 %v1086_v31 }
 0x3ad   :  { %877 = vmatprep.mubr.bf16.mxu0 %v1091_v32 }
 0x3b4   :  { %878 = vmatmul.mubr.bf16.gmra.mrb[20].mxu0 %v1098_v33 }
 0x47f   :  { %v875_v26 = vpop.f32.mrb[16].mxu0 }
 0x480   :  { %v489_v27 = vadd.f32 %v875_v26, %v755_v25  ;;  %v480_v28 = vpop.f32.mrb[17].mxu0 }
 0x481   :  { %v481_v29 = vadd.f32 %v755_v25, %v480_v28  ;;  %v876_v30 = vpop.f32.mrb[18].mxu0 }
 0x482   :  { %v492_v34 = vadd.f32 %v876_v30, %v755_v25  ;;  %v483_v31 = vpop.f32.mrb[19].mxu0  ;;  %v513_v32 = vmax.f32 %v489_v27, 0.0 }
 0x483   :  { %v484_v35 = vadd.f32 %v755_v25, %v483_v31  ;;  %v511_v33 = vmax.f32 %v481_v29, 0.0 }
 0x484   :  { %v514_v36 = vmax.f32 %v492_v34, 0.0 }
 0x485   :  { %v512_v37 = vmax.f32 %v484_v35, 0.0 }
 0x486   :  { %v520_v38 = vpack.c.bf16 %v514_v36, %v513_v32 }
 0x487   :  { %v519_v39 = vpack.c.bf16 %v512_v37, %v511_v33  ;;  %v879_v40 = vpop.f32.mrb[20].mxu0 }
 0x488   :  { %v505_v41 = vadd.f32 %v879_v40, %v755_v25  ;;  %v496_v42 = vpop.f32.mrb[21].mxu0 }
 0x489   :  { %v497_v43 = vadd.f32 %v755_v25, %v496_v42  ;;  %v880_v44 = vpop.f32.mrb[22].mxu0  ;;  %882 = vmatpush3.bf16.msra.mxu1 %v519_v39 }
 0x48a   :  { %v508_v45 = vadd.f32 %v880_v44, %v755_v25  ;;  %v499_v46 = vpop.f32.mrb[23].mxu0  ;;  %883 = vmatprep.subr.bf16.mxu1 %v978_v24  ;;  %v517_v48 = vmax.f32 %v505_v41, 0.0 }
 0x48b   :  { %v500_v47 = vadd.f32 %v755_v25, %v499_v46  ;;  %v515_v50 = vmax.f32 %v497_v43, 0.0 }
 0x48c   :  { %v518_v49 = vmax.f32 %v508_v45, 0.0 }
 0x48d   :  { %v516_v51 = vmax.f32 %v500_v47, 0.0  ;;  %884 = vmatpush3.bf16.msra.mxu1 %v520_v38 }
 0x48e   :  { %v522_v52 = vpack.c.bf16 %v518_v49, %v517_v48  ;;  %885 = vmatprep.subr.bf16.mxu1 %v978_v24 }
 0x48f   :  { %v521_v53 = vpack.c.bf16 %v516_v51, %v515_v50 }
 0x491   :  { %886 = vmatpush3.bf16.msra.mxu1 %v521_v53 }
 0x492   :  { %887 = vmatprep.subr.bf16.mxu1 %v978_v24 }
 0x495   :  { %888 = vmatpush3.bf16.msra.mxu1 %v522_v52 }
 0x496   :  { %893 = vmatprep.subr.bf16.mxu1 %v978_v24 }
 0x498   :  { %890 = vmatmul.mubr.msk.bf16.vlgmr.msra.gmra.mrb[8].mxu1 %vm524_vm3, %v523_v54 }
 0x499   :  { %894 = vmatpush3.bf16.msra.mxu1 %v925_v55  ;;  %897 = vmatprep.mubr.msk.bf16.mxu1 %vm979_vm2, %v978_v24 }
 0x49a   :  { %895 = vmatprep.subr.bf16.mxu1 %v978_v24 }
 0x49d   :  { %896 = vmatpush3.bf16.msra.mxu1 %v926_v56 }
 0x49e   :  { %901 = vmatprep.subr.bf16.mxu1 %v978_v24 }
 0x56b   :  { %v562_v57 = vpop.f32.mrb[8].mxu1 }
 0x56c   :  { %v570_v58 = vpack.c.bf16 %v562_v57, %v562_v57  ;;  %v891_v59 = vpop.f32.mrb[9].mxu1  ;;  %569 = vst.msk [vmem:[#allocation5] sm:$0x3] %vm568_vm4, %v562_v57 }
 0x56d   :  { %v565_v60 = vpop.f32.mrb[10].mxu1 }
 0x56e   :  { %v892_v61 = vpop.f32.mrb[11].mxu1  ;;  %898 = vmatmul.mubr.msk.bf16.vlgmr.msra.gmra.mrb[12].mxu1 %vm169_vm1, %v570_v58 }
 0x56f   :  { %905 = vmatprep.mubr.msk.bf16.mxu1 %vm979_vm2, %v978_v24  ;;  %902 = vmatpush3.bf16.msra.mxu1 %v927_v62 }
 0x570   :  { %903 = vmatprep.subr.bf16.mxu1 %v978_v24 }
 0x573   :  { %904 = vmatpush3.bf16.msra.mxu1 %v928_v63 }
 0x641   :  { %v631_v1 = vpop.f32.mrb[12].mxu1 }
 0x642   :  { %v632_v2 = vadd.f32 %v757_v0, %v631_v1  ;;  %v899_v3 = vpop.f32.mrb[13].mxu1 }
 0x643   :  { %v634_v4 = vpop.f32.mrb[14].mxu1 }
 0x644   :  { %v637_v5 = vmax.f32 %v632_v2, 0.0  ;;  %v900_v6 = vpop.f32.mrb[15].mxu1 }
 0x646   :  { %v638_v7 = vpack.c.bf16 %v637_v5, %v637_v5 }
 0x648   :  { %906 = vmatmul.mubr.msk.bf16.vlgmr.msra.gmra.mrb[16].mxu1 %vm169_vm1, %v638_v7 }
 0x649   :  { %940 = shalt.err (!%p937_p4)
}
 0x64a   :  { %s941_s17 = scalar_lea.hbm %s1192_s12, 32 }
 0x64b   :  { %p942_p5 = scmp.ne.s32.totalorder %s1192_s12, %s941_s17  ;;  %p945_p6 = scmp.lt.u32.totalorder %s941_s17, %s1192_s12 }
 0x64d   :  { %p947_p7 = pnand %p945_p6, %p942_p5 }
 0x64f   :  { %950 = shalt.err (!%p947_p7)
}
 0x650   :  { %726 = dma.vmem_to_hbm [thread:$0]  %s724_s15, 32, %s1192_s12, [#allocation6]   ;;  %v761_v8 = vld [vmem:[%s1190_s10] ss:$0 sm:$0xff]  ;;  %vm705_vm5 = vcmask 25600  }
 0x651   :  { %s981_s1 = smov [#allocation3]  }
 0x652   :  { %s713_s4 = sshll.u32 %s981_s1, 4  ;;  %s714_s4 = int_to_ptr.vmem [resolvable:$true] %s713_s4 }
 0x653   :  { %s951_s5 = scalar_lea.vmem %s714_s4, 32  ;;  %p956_p9 = scmp.lt.s32.totalorder %s714_s4, %s714_s4 }
 0x654   :  { %p952_p8 = scmp.ne.s32.totalorder %s714_s4, %s951_s5  ;;  %p957_p10 = scmp.lt.s32.totalorder %s951_s5, %s951_s5 }
 0x656   :  { %p958_p11 = por %p957_p10, %p956_p9 }
 0x658   :  { %p959_p12 = pnand %p958_p11, %p952_p8 }
 0x71b   :  { %v699_v9 = vpop.f32.mrb[16].mxu1 }
 0x71c   :  { %v700_v10 = vadd.f32 %v761_v8, %v699_v9  ;;  %v907_v11 = vpop.f32.mrb[17].mxu1 }
 0x71d   :  { %v702_v12 = vpop.f32.mrb[18].mxu1 }
 0x71e   :  { %v908_v13 = vpop.f32.mrb[19].mxu1  ;;  %706 = vst.msk [vmem:[#allocation3] sm:$0x3] %vm705_vm5, %v700_v10 }
 0x71f   :  { %962 = shalt.err (!%p959_p12)
}
 0x720   :  { %s963_s10 = scalar_lea.hbm %s1191_s11, 32 }
 0x721   :  { %p964_p13 = scmp.ne.s32.totalorder %s1191_s11, %s963_s10  ;;  %p967_p0 = scmp.lt.u32.totalorder %s963_s10, %s1191_s11 }
 0x723   :  { %p969_p1 = pnand %p967_p0, %p964_p13 }
 0x725   :  { %972 = shalt.err (!%p969_p1)
}
 0x726   :  { %716 = dma.vmem_to_hbm [thread:$0]  %s714_s4, 32, %s1191_s11, [#allocation4]  }
 0x727   :  { %973 = dma.done.wait [#allocation4], 32  }
 0x728   :  { %974 = vsyncadd [#allocation4], 4294967264 }
 0x729   :  { %975 = dma.done.wait [#allocation6], 32  }
 0x72a   :  { %976 = vsyncadd [#allocation6], 4294967264 }
 0x72b   :  { %733 = vsyncpa [#allocation4], 1 }
 0x72c   :  { %734 = vsyncpa [#allocation6], 1 }

</bundles_post_ra>
